<compile_context>
chip_gen: v6e
topology: v6e:2x2x1
jax: 0.10.0
libtpu: 0.0.40
codegen_flags: <defaults>
</compile_context>

<pallas_src>
import jax
import jax.numpy as jnp
from jax.experimental import pallas as pl
from jax.experimental.pallas import tpu as pltpu

CHANNELS = {'RN50': 1024, 'ViT-L/14': 768, 'tiny': 128}  # 'tiny' = small demo width


# ----------------------------------------------------------------------------
# Fused Pallas kernel: encode_image stand-in + fc + similarities + projectors
# ----------------------------------------------------------------------------
def _clip_fused_kernel(patch_ref, we_ref, be_ref, wh_ref, bh_ref,
                       fpw_ref, fpb_ref, wfc2_ref, sc_ref, *out_refs):
    D = wh_ref.shape[0]
    f32 = jnp.float32
    cdt = we_ref.dtype                    # compute dtype of the big operands (bf16)

    # ---- encode_image stand-in ------------------------------------------------
    # Pool BEFORE the embed matmul: mean(patches @ We + be) == mean(patches) @ We + be
    # (exact because the embed is linear). Cuts MXU FLOPs and VMEM by Np.
    pooled = jnp.mean(patch_ref[...].astype(f32), axis=1)                 # (BM, K)
    emb = jnp.dot(pooled.astype(cdt), we_ref[...],
                  preferred_element_type=f32) + be_ref[...]               # (BM, D)

    # Both linear heads in a single (D, 2D) matmul: [:, :D]=forgery, [:, D:]=semantic
    fs = jnp.dot(emb.astype(cdt), wh_ref[...],
                 preferred_element_type=f32) + bh_ref[...]                # (BM, 2D)
    forg = fs[:, :D]
    sem = fs[:, D:]

    # ---- CLIPModel head --------------------------------------------------------
    # forg @ fc_w.T and sem @ fc_w.T in one MXU pass via a block-diagonal (2D, 2)
    # weight; this also gives output = col0 + fc_b without any XLU lane reduce.
    pair = jnp.dot(fs.astype(cdt), wfc2_ref[...],
                   preferred_element_type=f32)                            # (BM, 2)
    auth = pair[:, 0:1]        # dotproduct_similarity(forgery_features, fc.weight)
    auth_old = pair[:, 1:2]    # dotproduct_similarity(semantic_features, fc.weight)
    fc_b, ap_w, ap_b = sc_ref[0], sc_ref[1], sc_ref[2]

    # forgery_proj(forgery_features): Linear(D, D)
    fproj = jnp.dot(forg.astype(cdt), fpw_ref[...],
                    preferred_element_type=f32) + fpb_ref[...]            # (BM, D)

    if len(out_refs) == 4:     # return_feature=True variant also emits forg
        fproj_ref, sem_ref, small_ref, forg_ref = out_refs
        forg_ref[...] = forg
    else:
        fproj_ref, sem_ref, small_ref = out_refs

    fproj_ref[...] = fproj
    sem_ref[...] = sem
    small_ref[:, 0:1] = auth + fc_b            # output = self.fc(forgery_features)
    small_ref[:, 1:2] = auth * ap_w + ap_b     # authenticity_proj(authenticity)
    small_ref[:, 2:3] = auth_old               # authenticity_old


# ----------------------------------------------------------------------------
# Glue
# ----------------------------------------------------------------------------
def extract_patches(x_nchw, patch):
    B, C, H, W = x_nchw.shape
    x = jnp.transpose(x_nchw, (0, 2, 3, 1))                            # NHWC
    x = x.reshape(B, H // patch, patch, W // patch, patch, C)
    x = jnp.transpose(x, (0, 1, 3, 2, 4, 5))
    return x.reshape(B, (H // patch) * (W // patch), patch * patch * C)


def init_params(key, in_ch, patch, dim, num_classes=1):
    assert num_classes == 1, "dotproduct_similarity head assumes num_classes == 1"
    K = patch * patch * in_ch
    ks = jax.random.split(key, 8)
    scale = 0.1
    return dict(
        w_embed=scale * jax.random.normal(ks[0], (K, dim), jnp.float32),
        b_embed=scale * jax.random.normal(ks[1], (1, dim), jnp.float32),
        w_sem=scale * jax.random.normal(ks[2], (dim, dim), jnp.float32),
        b_sem=jnp.zeros((1, dim), jnp.float32),
        w_forg=scale * jax.random.normal(ks[3], (dim, dim), jnp.float32),
        b_forg=jnp.zeros((1, dim), jnp.float32),
        fc_w=scale * jax.random.normal(ks[4], (num_classes, dim), jnp.float32),
        fc_b=scale * jax.random.normal(ks[5], (1, num_classes), jnp.float32),
        fp_w=scale * jax.random.normal(ks[6], (dim, dim), jnp.float32),   # forgery_proj
        fp_b=jnp.zeros((1, dim), jnp.float32),
        ap_w=scale * jax.random.normal(ks[7], (1, 1), jnp.float32),       # authenticity_proj
        ap_b=jnp.zeros((1, 1), jnp.float32),
    )


def prepare_params(params, dtype=jnp.bfloat16):
    """One-time packing: transposes, head fusion, bf16 cast, SMEM scalar pack."""
    D = params['w_embed'].shape[1]
    w_heads = jnp.concatenate([params['w_forg'], params['w_sem']], axis=1)   # (D, 2D)
    b_heads = jnp.concatenate([params['b_forg'], params['b_sem']], axis=1)   # (1, 2D)
    fc_col = params['fc_w'].T                                                # (D, 1)
    w_fc2 = jnp.zeros((2 * D, 2), jnp.float32)
    w_fc2 = w_fc2.at[:D, 0:1].set(fc_col).at[D:, 1:2].set(fc_col)            # block-diag
    return dict(
        w_embed=params['w_embed'].astype(dtype),
        b_embed=params['b_embed'].astype(jnp.float32),
        w_heads=w_heads.astype(dtype),
        b_heads=b_heads.astype(jnp.float32),
        fp_wt=params['fp_w'].T.astype(dtype),
        fp_b=params['fp_b'].astype(jnp.float32),
        w_fc2=w_fc2.astype(dtype),
        scalars=jnp.array([params['fc_b'][0, 0], params['ap_w'][0, 0],
                           params['ap_b'][0, 0]], jnp.float32),
    )


def clip_model_forward(x_nchw, prep, patch, return_feature=False, block_b=8):
    B = x_nchw.shape[0]
    K, D = prep['w_embed'].shape
    patches = extract_patches(x_nchw, patch).astype(prep['w_embed'].dtype)
    Np = patches.shape[1]

    # pad batch to a multiple of the batch tile (8-sublane aligned)
    Bp = ((B + block_b - 1) // block_b) * block_b
    if Bp != B:
        patches = jnp.pad(patches, ((0, Bp - B), (0, 0), (0, 0)))

    out_shapes = [jax.ShapeDtypeStruct((Bp, D), jnp.float32),   # forgery_proj(forg)
                  jax.ShapeDtypeStruct((Bp, D), jnp.float32),   # semantic_features
                  jax.ShapeDtypeStruct((Bp, 3), jnp.float32)]   # [fc out | aproj | auth_old]
    out_specs = [pl.BlockSpec((block_b, D), lambda b: (b, 0)),
                 pl.BlockSpec((block_b, D), lambda b: (b, 0)),
                 pl.BlockSpec((block_b, 3), lambda b: (b, 0))]
    if return_feature:
        out_shapes.append(jax.ShapeDtypeStruct((Bp, D), jnp.float32))   # forgery_features
        out_specs.append(pl.BlockSpec((block_b, D), lambda b: (b, 0)))

    rep = lambda b: (0, 0)   # weights: same block for every batch tile
    in_specs = [
        pl.BlockSpec((block_b, Np, K), lambda b: (b, 0, 0)),
        pl.BlockSpec((K, D), rep),
        pl.BlockSpec((1, D), rep),
        pl.BlockSpec((D, 2 * D), rep),
        pl.BlockSpec((1, 2 * D), rep),
        pl.BlockSpec((D, D), rep),
        pl.BlockSpec((1, D), rep),
        pl.BlockSpec((2 * D, 2), rep),
        pl.BlockSpec(memory_space=pltpu.MemorySpace.SMEM),      # [fc_b, ap_w, ap_b]
    ]

    outs = pl.pallas_call(
        _clip_fused_kernel,
        grid=(Bp // block_b,),
        out_shape=tuple(out_shapes),
        in_specs=in_specs,
        out_specs=tuple(out_specs),
        compiler_params=pltpu.CompilerParams(
            dimension_semantics=("parallel",),          # shard batch tiles across TCs
            vmem_limit_bytes=48 * 1024 * 1024),         # safe on v5e/v6e/v7x
    )(patches, prep['w_embed'], prep['b_embed'], prep['w_heads'],
      prep['b_heads'], prep['fp_wt'], prep['fp_b'], prep['w_fc2'],
      prep['scalars'])

    fproj, sem, small = outs[0][:B], outs[1][:B], outs[2][:B]
    output = small[:, 0:1]
    aproj = small[:, 1:2]
    auth_old = small[:, 2:3]
    if return_feature:
        forg = outs[3][:B]
        return output, forg, sem
    return fproj, aproj, sem, output, auth_old


def reference_forward(x_nchw, params, patch):
    """Pure-JAX f32 reference of the original module math (un-fused ordering)."""
    p = params
    patches = extract_patches(x_nchw, patch)
    emb = jnp.einsum('bpk,kd->bpd', patches, p['w_embed']) + p['b_embed']
    pooled = emb.mean(axis=1)
    sem = pooled @ p['w_sem'] + p['b_sem']
    forg = pooled @ p['w_forg'] + p['b_forg']
    output = forg @ p['fc_w'].T + p['fc_b']
    auth = jnp.sum(forg * p['fc_w'], axis=1, keepdims=True)
    auth_old = jnp.sum(sem * p['fc_w'], axis=1, keepdims=True)
    fproj = forg @ p['fp_w'].T + p['fp_b']
    aproj = auth @ p['ap_w'].T + p['ap_b']
    return fproj, aproj, sem, output, auth_old


if __name__ == "__main__":
    name = 'tiny'               # small stand-in width; 'RN50'/'ViT-L/14' also work
    B, C_in, H, W, PATCH = 2, 3, 16, 16, 8
    D = CHANNELS[name]

    key = jax.random.PRNGKey(0)
    kx, kp = jax.random.split(key)
    x = jax.random.normal(kx, (B, C_in, H, W), jnp.float32)   # NCHW, like PyTorch
    params = init_params(kp, C_in, PATCH, D, num_classes=1)
    prep = prepare_params(params, dtype=jnp.bfloat16)         # one-time packing/cast

    outs = clip_model_forward(x, prep, PATCH)
    outs = jax.block_until_ready(outs)

    # Kernel runs in bf16 (f32 accumulation); compare against the f32 reference
    # with a correspondingly looser tolerance.
    refs = reference_forward(x, params, PATCH)
    for o, r in zip(outs, refs):
        assert o.shape == r.shape and o.dtype == r.dtype
        assert jnp.allclose(o, r, rtol=5e-2, atol=5e-2), "mismatch vs reference"

    # return_feature=True path: (output, forgery_features, semantic_features)
    out2 = jax.block_until_ready(clip_model_forward(x, prep, PATCH, return_feature=True))
    assert out2[0].shape == (B, 1) and out2[1].shape == (B, D) and out2[2].shape == (B, D)

    print("KERNEL_OK")
</pallas_src>

<mosaic_0001>
module attributes {stable_mosaic.version = 11 : i64} {
  func.func @_clip_fused_kernel(%arg0: i32, %arg1: memref<8x4x192xbf16, #tpu.memory_space<vmem>>, %arg2: memref<192x128xbf16, #tpu.memory_space<vmem>>, %arg3: memref<1x128xf32, #tpu.memory_space<vmem>>, %arg4: memref<128x256xbf16, #tpu.memory_space<vmem>>, %arg5: memref<1x256xf32, #tpu.memory_space<vmem>>, %arg6: memref<128x128xbf16, #tpu.memory_space<vmem>>, %arg7: memref<1x128xf32, #tpu.memory_space<vmem>>, %arg8: memref<256x2xbf16, #tpu.memory_space<vmem>>, %arg9: memref<3xf32, #tpu.memory_space<smem>>, %arg10: memref<8x128xf32, #tpu.memory_space<vmem>>, %arg11: memref<8x128xf32, #tpu.memory_space<vmem>>, %arg12: memref<8x3xf32, #tpu.memory_space<vmem>>) attributes {dimension_semantics = [#tpu.dimension_semantics<parallel>], iteration_bounds = array<i64: 1>, scalar_prefetch = 0 : i64, scratch_operands = 0 : i64, tpu.core_type = #tpu.core_type<tc>, window_params = [{transform_indices = @transform_0, window_bounds = array<i64: 8, 4, 192>}, {pipeline_mode = #tpu.pipeline_mode<synchronous>, transform_indices = @transform_1, window_bounds = array<i64: 192, 128>}, {pipeline_mode = #tpu.pipeline_mode<synchronous>, transform_indices = @transform_2, window_bounds = array<i64: 1, 128>}, {pipeline_mode = #tpu.pipeline_mode<synchronous>, transform_indices = @transform_3, window_bounds = array<i64: 128, 256>}, {pipeline_mode = #tpu.pipeline_mode<synchronous>, transform_indices = @transform_4, window_bounds = array<i64: 1, 256>}, {pipeline_mode = #tpu.pipeline_mode<synchronous>, transform_indices = @transform_5, window_bounds = array<i64: 128, 128>}, {pipeline_mode = #tpu.pipeline_mode<synchronous>, transform_indices = @transform_6, window_bounds = array<i64: 1, 128>}, {pipeline_mode = #tpu.pipeline_mode<synchronous>, transform_indices = @transform_7, window_bounds = array<i64: 256, 2>}, {transform_indices = @transform_8, window_bounds = array<i64: 3>}, {transform_indices = @transform_9, window_bounds = array<i64: 8, 128>}, {transform_indices = @transform_10, window_bounds = array<i64: 8, 128>}, {transform_indices = @transform_11, window_bounds = array<i64: 8, 3>}]} {
    %c0 = arith.constant 0 : index
    %c0_0 = arith.constant 0 : index
    %c0_1 = arith.constant 0 : index
    %0 = vector.load %arg1[%c0, %c0_0, %c0_1] : memref<8x4x192xbf16, #tpu.memory_space<vmem>>, vector<8x4x192xbf16>
    %1 = arith.extf %0 : vector<8x4x192xbf16> to vector<8x4x192xf32>
    %cst = arith.constant dense<0.000000e+00> : vector<8x192xf32>
    %2 = vector.multi_reduction <add>, %1, %cst [1] : vector<8x4x192xf32> to vector<8x192xf32>
    %cst_2 = arith.constant 4.000000e+00 : f32
    %3 = vector.broadcast %cst_2 : f32 to vector<8x192xf32>
    %4 = arith.divf %2, %3 : vector<8x192xf32>
    %5 = arith.truncf %4 : vector<8x192xf32> to vector<8x192xbf16>
    %c0_3 = arith.constant 0 : index
    %c0_4 = arith.constant 0 : index
    %6 = vector.load %arg2[%c0_3, %c0_4] : memref<192x128xbf16, #tpu.memory_space<vmem>>, vector<192x128xbf16>
    %cst_5 = arith.constant dense<0.000000e+00> : vector<8x128xf32>
    %7 = tpu.matmul %5, %6, %cst_5 {dimension_numbers = #tpu.dot_dimension_numbers<[1], [0], [0], [1], [0, 0, 1, 1], [], []>} : vector<8x192xbf16>, vector<192x128xbf16>, vector<8x128xf32> -> vector<8x128xf32>
    %c0_6 = arith.constant 0 : index
    %c0_7 = arith.constant 0 : index
    %8 = vector.load %arg3[%c0_6, %c0_7] : memref<1x128xf32, #tpu.memory_space<vmem>>, vector<1x128xf32>
    %9 = vector.broadcast %8 : vector<1x128xf32> to vector<8x128xf32>
    %10 = arith.addf %7, %9 : vector<8x128xf32>
    %11 = arith.truncf %10 : vector<8x128xf32> to vector<8x128xbf16>
    %c0_8 = arith.constant 0 : index
    %c0_9 = arith.constant 0 : index
    %12 = vector.load %arg4[%c0_8, %c0_9] : memref<128x256xbf16, #tpu.memory_space<vmem>>, vector<128x256xbf16>
    %cst_10 = arith.constant dense<0.000000e+00> : vector<8x256xf32>
    %13 = tpu.matmul %11, %12, %cst_10 {dimension_numbers = #tpu.dot_dimension_numbers<[1], [0], [0], [1], [0, 0, 1, 1], [], []>} : vector<8x128xbf16>, vector<128x256xbf16>, vector<8x256xf32> -> vector<8x256xf32>
    %c0_11 = arith.constant 0 : index
    %c0_12 = arith.constant 0 : index
    %14 = vector.load %arg5[%c0_11, %c0_12] : memref<1x256xf32, #tpu.memory_space<vmem>>, vector<1x256xf32>
    %15 = vector.broadcast %14 : vector<1x256xf32> to vector<8x256xf32>
    %16 = arith.addf %13, %15 : vector<8x256xf32>
    %17 = vector.extract_strided_slice %16 {offsets = [0, 0], sizes = [8, 128], strides = [1, 1]} : vector<8x256xf32> to vector<8x128xf32>
    %18 = vector.extract_strided_slice %16 {offsets = [0, 128], sizes = [8, 128], strides = [1, 1]} : vector<8x256xf32> to vector<8x128xf32>
    %19 = arith.truncf %16 : vector<8x256xf32> to vector<8x256xbf16>
    %c0_13 = arith.constant 0 : index
    %c0_14 = arith.constant 0 : index
    %20 = vector.load %arg8[%c0_13, %c0_14] : memref<256x2xbf16, #tpu.memory_space<vmem>>, vector<256x2xbf16>
    %cst_15 = arith.constant dense<0.000000e+00> : vector<8x2xf32>
    %21 = tpu.matmul %19, %20, %cst_15 {dimension_numbers = #tpu.dot_dimension_numbers<[1], [0], [0], [1], [0, 0, 1, 1], [], []>} : vector<8x256xbf16>, vector<256x2xbf16>, vector<8x2xf32> -> vector<8x2xf32>
    %22 = vector.extract_strided_slice %21 {offsets = [0, 0], sizes = [8, 1], strides = [1, 1]} : vector<8x2xf32> to vector<8x1xf32>
    %23 = vector.extract_strided_slice %21 {offsets = [0, 1], sizes = [8, 1], strides = [1, 1]} : vector<8x2xf32> to vector<8x1xf32>
    %c0_16 = arith.constant 0 : index
    %24 = memref.load %arg9[%c0_16] : memref<3xf32, #tpu.memory_space<smem>>
    %c1 = arith.constant 1 : index
    %25 = memref.load %arg9[%c1] : memref<3xf32, #tpu.memory_space<smem>>
    %c2 = arith.constant 2 : index
    %26 = memref.load %arg9[%c2] : memref<3xf32, #tpu.memory_space<smem>>
    %27 = arith.truncf %17 : vector<8x128xf32> to vector<8x128xbf16>
    %c0_17 = arith.constant 0 : index
    %c0_18 = arith.constant 0 : index
    %28 = vector.load %arg6[%c0_17, %c0_18] : memref<128x128xbf16, #tpu.memory_space<vmem>>, vector<128x128xbf16>
    %cst_19 = arith.constant dense<0.000000e+00> : vector<8x128xf32>
    %29 = tpu.matmul %27, %28, %cst_19 {dimension_numbers = #tpu.dot_dimension_numbers<[1], [0], [0], [1], [0, 0, 1, 1], [], []>} : vector<8x128xbf16>, vector<128x128xbf16>, vector<8x128xf32> -> vector<8x128xf32>
    %c0_20 = arith.constant 0 : index
    %c0_21 = arith.constant 0 : index
    %30 = vector.load %arg7[%c0_20, %c0_21] : memref<1x128xf32, #tpu.memory_space<vmem>>, vector<1x128xf32>
    %31 = vector.broadcast %30 : vector<1x128xf32> to vector<8x128xf32>
    %32 = arith.addf %29, %31 : vector<8x128xf32>
    %c0_22 = arith.constant 0 : index
    %c0_23 = arith.constant 0 : index
    %33 = vector.load %arg10[%c0_22, %c0_23] : memref<8x128xf32, #tpu.memory_space<vmem>>, vector<8x128xf32>
    tpu.vector_store %arg10[%c0_22, %c0_23], %32 {strides = array<i32>} : memref<8x128xf32, #tpu.memory_space<vmem>>, vector<8x128xf32>,
    %c0_24 = arith.constant 0 : index
    %c0_25 = arith.constant 0 : index
    %34 = vector.load %arg11[%c0_24, %c0_25] : memref<8x128xf32, #tpu.memory_space<vmem>>, vector<8x128xf32>
    tpu.vector_store %arg11[%c0_24, %c0_25], %18 {strides = array<i32>} : memref<8x128xf32, #tpu.memory_space<vmem>>, vector<8x128xf32>,
    %35 = vector.broadcast %24 : f32 to vector<8x1xf32>
    %36 = arith.addf %22, %35 : vector<8x1xf32>
    %c0_26 = arith.constant 0 : index
    %c0_27 = arith.constant 0 : index
    %37 = vector.load %arg12[%c0_26, %c0_27] : memref<8x3xf32, #tpu.memory_space<vmem>>, vector<8x1xf32>
    tpu.vector_store %arg12[%c0_26, %c0_27], %36 {strides = array<i32>} : memref<8x3xf32, #tpu.memory_space<vmem>>, vector<8x1xf32>,
    %38 = vector.broadcast %25 : f32 to vector<8x1xf32>
    %39 = arith.mulf %22, %38 : vector<8x1xf32>
    %40 = vector.broadcast %26 : f32 to vector<8x1xf32>
    %41 = arith.addf %39, %40 : vector<8x1xf32>
    %c0_28 = arith.constant 0 : index
    %c1_29 = arith.constant 1 : index
    %42 = vector.load %arg12[%c0_28, %c1_29] : memref<8x3xf32, #tpu.memory_space<vmem>>, vector<8x1xf32>
    tpu.vector_store %arg12[%c0_28, %c1_29], %41 {strides = array<i32>} : memref<8x3xf32, #tpu.memory_space<vmem>>, vector<8x1xf32>,
    %c0_30 = arith.constant 0 : index
    %c2_31 = arith.constant 2 : index
    %43 = vector.load %arg12[%c0_30, %c2_31] : memref<8x3xf32, #tpu.memory_space<vmem>>, vector<8x1xf32>
    tpu.vector_store %arg12[%c0_30, %c2_31], %23 {strides = array<i32>} : memref<8x3xf32, #tpu.memory_space<vmem>>, vector<8x1xf32>,
    return
  }
  func.func @transform_0(%arg0: i32) -> (i32, i32, i32) {
    %c0_i32 = arith.constant 0 : i32
    %c0_i32_0 = arith.constant 0 : i32
    %c0_i32_1 = arith.constant 0 : i32
    return %arg0, %c0_i32, %c0_i32_0 : i32, i32, i32
  }
  func.func @transform_1(%arg0: i32) -> (i32, i32) {
    %c0_i32 = arith.constant 0 : i32
    %c0_i32_0 = arith.constant 0 : i32
    %c0_i32_1 = arith.constant 0 : i32
    return %c0_i32, %c0_i32_0 : i32, i32
  }
  func.func @transform_2(%arg0: i32) -> (i32, i32) {
    %c0_i32 = arith.constant 0 : i32
    %c0_i32_0 = arith.constant 0 : i32
    %c0_i32_1 = arith.constant 0 : i32
    return %c0_i32, %c0_i32_0 : i32, i32
  }
  func.func @transform_3(%arg0: i32) -> (i32, i32) {
    %c0_i32 = arith.constant 0 : i32
    %c0_i32_0 = arith.constant 0 : i32
    %c0_i32_1 = arith.constant 0 : i32
    return %c0_i32, %c0_i32_0 : i32, i32
  }
  func.func @transform_4(%arg0: i32) -> (i32, i32) {
    %c0_i32 = arith.constant 0 : i32
    %c0_i32_0 = arith.constant 0 : i32
    %c0_i32_1 = arith.constant 0 : i32
    return %c0_i32, %c0_i32_0 : i32, i32
  }
  func.func @transform_5(%arg0: i32) -> (i32, i32) {
    %c0_i32 = arith.constant 0 : i32
    %c0_i32_0 = arith.constant 0 : i32
    %c0_i32_1 = arith.constant 0 : i32
    return %c0_i32, %c0_i32_0 : i32, i32
  }
  func.func @transform_6(%arg0: i32) -> (i32, i32) {
    %c0_i32 = arith.constant 0 : i32
    %c0_i32_0 = arith.constant 0 : i32
    %c0_i32_1 = arith.constant 0 : i32
    return %c0_i32, %c0_i32_0 : i32, i32
  }
  func.func @transform_7(%arg0: i32) -> (i32, i32) {
    %c0_i32 = arith.constant 0 : i32
    %c0_i32_0 = arith.constant 0 : i32
    %c0_i32_1 = arith.constant 0 : i32
    return %c0_i32, %c0_i32_0 : i32, i32
  }
  func.func @transform_8(%arg0: i32) -> i32 {
    %c0_i32 = arith.constant 0 : i32
    %c0_i32_0 = arith.constant 0 : i32
    return %c0_i32 : i32
  }
  func.func @transform_9(%arg0: i32) -> (i32, i32) {
    %c0_i32 = arith.constant 0 : i32
    %c0_i32_0 = arith.constant 0 : i32
    return %arg0, %c0_i32 : i32, i32
  }
  func.func @transform_10(%arg0: i32) -> (i32, i32) {
    %c0_i32 = arith.constant 0 : i32
    %c0_i32_0 = arith.constant 0 : i32
    return %arg0, %c0_i32 : i32, i32
  }
  func.func @transform_11(%arg0: i32) -> (i32, i32) {
    %c0_i32 = arith.constant 0 : i32
    %c0_i32_0 = arith.constant 0 : i32
    return %arg0, %c0_i32 : i32, i32
  }
}

</mosaic_0001>

<bundles_post_ra>
// kernel: tpu_custom_call.1
= control target key start
LH: loop header
LB: loop body
LE: loop exit
PB: predicated region body
PF: predicated region fallthrough
CT: control target
= control target key end

     0   :  { %17 = vsyncpa [#allocation3], 0  ;;  %s1600_s0 = inlined_call_operand.hbm [shape: bf16[8,4,192], index: 0, kind: input, shape index: {}]   ;;  %s1601_s1 = inlined_call_operand.hbm [shape: bf16[192,128], index: 1, kind: input, shape index: {}]   ;;  %s1602_s2 = inlined_call_operand.vmem [shape: f32[1,128], index: 2, kind: input, shape index: {}]   ;;  %s1603_s3 = inlined_call_operand.vmem [shape: bf16[128,256], index: 3, kind: input, shape index: {}]   ;;  %s1604_s4 = inlined_call_operand.vmem [shape: f32[1,256], index: 4, kind: input, shape index: {}]   ;;  %s1605_s5 = inlined_call_operand.hbm [shape: bf16[128,128], index: 5, kind: input, shape index: {}]   ;;  %s1606_s6 = inlined_call_operand.vmem [shape: f32[1,128], index: 6, kind: input, shape index: {}]   ;;  %s1607_s7 = inlined_call_operand.vmem [shape: bf16[256,2], index: 7, kind: input, shape index: {}]   ;;  %s1608_s8 = inlined_call_operand.vmem [shape: f32[3], index: 8, kind: input, shape index: {}]   ;;  %s1609_s9 = inlined_call_operand.hbm [shape: f32[8,128], index: 9, kind: output, shape index: {0}]   ;;  %s1610_s10 = inlined_call_operand.hbm [shape: f32[8,128], index: 10, kind: output, shape index: {1}]   ;;  %s1611_s11 = inlined_call_operand.vmem [shape: f32[8,3], index: 11, kind: output, shape index: {2}]  }
   0x1   :  { %18 = vsyncpa [#allocation7], 0 }
   0x2   :  { %19 = vsyncpa [#allocation5], 0 }
   0x3   :  { %20 = vsyncpa [#allocation4], 0 }
   0x4   :  { %21 = vsyncpa [#allocation12], 0  ;;  %s1294_s17 = smov [#allocation6]   ;;  %s1295_s19 = smov [#allocation2]  }
   0x5   :  { %s39_s18 = sshll.u32 %s1294_s17, 4  ;;  %s27_s20 = sshll.u32 %s1295_s19, 4  ;;  %s40_s18 = int_to_ptr.vmem [resolvable:$true] %s39_s18  ;;  %s28_s20 = int_to_ptr.vmem [resolvable:$true] %s27_s20 }
   0x6   :  { %s1180_s21 = scalar_lea.vmem %s40_s18, 1536  ;;  %p1185_p1 = scmp.lt.s32.totalorder %s40_s18, %s40_s18 }
   0x7   :  { %p1181_p0 = scmp.ne.s32.totalorder %s40_s18, %s1180_s21  ;;  %p1186_p2 = scmp.lt.s32.totalorder %s1180_s21, %s1180_s21 }
   0x9   :  { %p1187_p3 = por %p1186_p2, %p1185_p1 }
   0xb   :  { %p1188_p4 = pnand %p1187_p3, %p1181_p0 }
   0xd   :  { %1191 = shalt.err (!%p1188_p4)
}
   0xe   :  { %s1296_s22 = smov 64   ;;  %s1297_s23 = smov 4  }
   0xf   :  { %45 = dma.hbm_to_vmem [thread:$0]  %s1601_s1, 1536, %s40_s18, [#allocation7], %s1296_s22, %s1296_s22, %s1297_s23  }
  0x10   :  { %s1200_s26 = scalar_lea.vmem %s28_s20, 512  ;;  %p1205_p6 = scmp.lt.s32.totalorder %s28_s20, %s28_s20 }
  0x11   :  { %p1201_p5 = scmp.ne.s32.totalorder %s28_s20, %s1200_s26  ;;  %p1206_p7 = scmp.lt.s32.totalorder %s1200_s26, %s1200_s26 }
  0x13   :  { %p1207_p8 = por %p1206_p7, %p1205_p6 }
  0x15   :  { %p1208_p9 = pnand %p1207_p8, %p1201_p5 }
  0x17   :  { %1211 = shalt.err (!%p1208_p9)
}
  0x18   :  { %33 = dma.hbm_to_vmem [thread:$0]  %s1600_s0, 512, %s28_s20, [#allocation3], %s1296_s22, %s1296_s22, %s1297_s23  }
  0x19   :  { %s74_s12 = sshll.u32 %s1608_s8, 4  ;;  %s1298_s13 = smov [#allocation8]   ;;  %s75_s12 = int_to_ptr.vmem [resolvable:$true] %s74_s12 }
  0x1a   :  { %s57_s14 = sshll.u32 %s1298_s13, 4  ;;  %s58_s14 = int_to_ptr.vmem [resolvable:$true] %s57_s14 }
  0x1b   :  { %s1220_s1 = scalar_lea.vmem %s58_s14, 1024  ;;  %p1225_p11 = scmp.lt.s32.totalorder %s58_s14, %s58_s14 }
  0x1c   :  { %p1221_p10 = scmp.ne.s32.totalorder %s58_s14, %s1220_s1  ;;  %p1226_p12 = scmp.lt.s32.totalorder %s1220_s1, %s1220_s1 }
  0x1e   :  { %p1227_p13 = por %p1226_p12, %p1225_p11 }
  0x20   :  { %p1228_p0 = pnand %p1227_p13, %p1221_p10 }
  0x22   :  { %1231 = shalt.err (!%p1228_p0)
}
  0x23   :  { %63 = dma.hbm_to_vmem [thread:$0]  %s1605_s5, 1024, %s58_s14, [#allocation7], %s1296_s22, %s1296_s22, %s1297_s23  }
  0x24   :  { %s1232_s0 = scalar_lea.vmem %s75_s12, 16  ;;  %p1237_p2 = scmp.lt.s32.totalorder %s75_s12, %s75_s12 }
  0x25   :  { %p1233_p1 = scmp.ne.s32.totalorder %s75_s12, %s1232_s0  ;;  %p1238_p3 = scmp.lt.s32.totalorder %s1232_s0, %s1232_s0 }
  0x27   :  { %p1239_p4 = por %p1238_p3, %p1237_p2 }
  0x29   :  { %p1240_p5 = pnand %p1239_p4, %p1233_p1 }
  0x2b   :  { %1243 = shalt.err (!%p1240_p5)
}
  0x2c   :  { %s1299_s8 = smov [#allocation9]  }
  0x2d   :  { %77 = dma.vmem_to_smem %s75_s12, 16, %s1299_s8, [#allocation5]  }
  0x2e   :  { %1284 = dma.done.wait [#allocation3], 512  }
  0x2f   :  { %1285 = vsyncadd [#allocation3], 4294966784 }
  0x30   :  { %1286 = dma.done.wait [#allocation7], 2560  }
  0x31   :  { %1287 = vsyncadd [#allocation7], 4294964736 }
  0x32   :  { %1288 = dma.done.wait [#allocation5], 16  }
  0x33   :  { %1289 = vsyncadd [#allocation5], 4294967280 }
  0x34   :  { %90 = sfence }
  0x35   :  { %v1112_v0 = vld [vmem:[#allocation6 + $0x38] sm:$0xff]   ;;  %v1300_v1 = vmov 0   ;;  %v1113_v2 = vld [vmem:[#allocation6 + $0x30] sm:$0xff]   ;;  %v1114_v3 = vld [vmem:[#allocation6 + $0x28] sm:$0xff]   ;;  %vm140_vm0 = vcmask 519168   ;;  %vm342_vm1 = vcmask 1041409  }
  0x36   :  { %442 = vmatprep.subr.bf16.mxu0 %v1300_v1  ;;  %623 = vmatprep.mubr.bf16.mxu1 %v1300_v1  ;;  %v1115_v4 = vld [vmem:[#allocation6 + $0x20] sm:$0xff]   ;;  %v1116_v5 = vld [vmem:[#allocation6 + $0x18] sm:$0xff]   ;;  %v1046_v7 = vld [vmem:[#allocation2 + $0x8] sm:$0xff]   ;;  %vm132_vm2 = vcmask 1043456   ;;  %vm344_vm3 = vcmask 1042434   ;;  %vm346_vm4 = vcmask 1043459  }
  0x37   :  { %443 = vmatpush1.bf16.msra.mxu0 %v1112_v0  ;;  %v1031_v6 = vld [vmem:[#allocation2] sm:$0xff]   ;;  %v1047_v8 = vld [vmem:[#allocation2 + $0x10] sm:$0xff]   ;;  %v1387_v11 = vunpack.c.l.bf16 %v1046_v7  ;;  %v1389_v12 = vunpack.c.h.bf16 %v1046_v7  ;;  %v1048_v13 = vld [vmem:[#allocation2 + $0x18] sm:$0xff]   ;;  %vm348_vm5 = vcmask 1044484   ;;  %vm350_vm6 = vcmask 1045509   ;;  %s1575_s1 = sld [smem:[#allocation9 + $0x1]] }
  0x38   :  { %444 = vmatprep.subr.bf16.mxu0 %v1300_v1  ;;  %v1383_v9 = vunpack.c.l.bf16 %v1031_v6  ;;  %v1385_v10 = vunpack.c.h.bf16 %v1031_v6  ;;  %v1391_v14 = vunpack.c.l.bf16 %v1047_v8  ;;  %v1393_v15 = vunpack.c.h.bf16 %v1047_v8  ;;  %v1124_v18 = vld [vmem:[%s1603_s3 + $0x74] ss:$8 sps:$4 sm:$0xff]   ;;  %v1126_v19 = vld [vmem:[%s1603_s3 + $0x70] ss:$8 sps:$4 sm:$0xff]   ;;  %v1127_v24 = vld [vmem:[%s1603_s3 + $0x64] ss:$8 sps:$4 sm:$0xff]  }
  0x39   :  { %v1395_v16 = vunpack.c.l.bf16 %v1048_v13  ;;  %v1397_v17 = vunpack.c.h.bf16 %v1048_v13  ;;  %v118_v22 = vcombine.high %v1387_v11, %v1387_v11  ;;  %v119_v23 = vcombine.high %v1389_v12, %v1389_v12  ;;  %v1117_v25 = vld [vmem:[#allocation6 + $0x10] sm:$0xff]   ;;  %591 = vmatprep.subr.bf16.mxu1 %v1124_v18  ;;  %v1129_v30 = vld [vmem:[%s1603_s3 + $0x60] ss:$8 sps:$4 sm:$0xff]   ;;  %v1133_v58 = vld [vmem:[%s1603_s3 + $0x44] ss:$8 sps:$4 sm:$0xff]   ;;  %s1580_s16 = sld [smem:[#allocation9 + $0x2]] }
  0x3a   :  { %v116_v20 = vcombine.high %v1383_v9, %v1383_v9  ;;  %v117_v21 = vcombine.high %v1385_v10, %v1385_v10  ;;  %v120_v26 = vcombine.high %v1391_v14, %v1391_v14  ;;  %v121_v27 = vcombine.high %v1393_v15, %v1393_v15  ;;  %592 = vmatpush1.bf16.msra.mxu1 %v1126_v19  ;;  %v1130_v35 = vld [vmem:[%s1603_s3 + $0x54] ss:$8 sps:$4 sm:$0xff]   ;;  %v1118_v44 = vld [vmem:[#allocation6 + $0x8] sm:$0xff]   ;;  %v1132_v53 = vld [vmem:[%s1603_s3 + $0x50] ss:$8 sps:$4 sm:$0xff]   ;;  %s1303_s0 = smov [#allocation10]  }
  0x3b   :  { %445 = vmatpush1.bf16.msra.mxu0 %v1113_v2  ;;  %v122_v28 = vcombine.high %v1395_v16, %v1395_v16  ;;  %v123_v29 = vcombine.high %v1397_v17, %v1397_v17  ;;  %v169_v33 = vsel %vm140_vm0, %v118_v22, 0.0  ;;  %v183_v34 = vsel %vm140_vm0, %v119_v23, 0.0  ;;  %593 = vmatprep.subr.bf16.mxu1 %v1127_v24  ;;  %v1119_v63 = vld [vmem:[#allocation6] sm:$0xff]   ;;  %v1136_v22 = vld [vmem:[%s1603_s3 + $0x34] ss:$8 sps:$4 sm:$0xff]   ;;  %s944_s8 = sshll.u32 %s1303_s0, 4  ;;  %s945_s8 = int_to_ptr.vmem [resolvable:$true] %s944_s8 }
  0x3c   :  { %446 = vmatprep.subr.bf16.mxu0 %v1300_v1  ;;  %v141_v31 = vsel %vm140_vm0, %v116_v20, 0.0  ;;  %v155_v32 = vsel %vm140_vm0, %v117_v21, 0.0  ;;  %v170_v38 = vrot.slane %v169_v33, 4  ;;  %v184_v39 = vrot.slane %v183_v34, 4  ;;  %v1135_v13 = vld [vmem:[%s1603_s3 + $0x40] ss:$8 sps:$4 sm:$0xff]  }
  0x3d   :  { %v142_v36 = vrot.slane %v141_v31, 4  ;;  %v156_v37 = vrot.slane %v155_v32, 4  ;;  %v197_v40 = vsel %vm140_vm0, %v120_v26, 0.0  ;;  %v211_v41 = vsel %vm140_vm0, %v121_v27, 0.0  ;;  %v1138_v27 = vld [vmem:[%s1603_s3 + $0x30] ss:$8 sps:$4 sm:$0xff]  }
  0x3e   :  { %v225_v42 = vsel %vm140_vm0, %v122_v28, 0.0  ;;  %v239_v43 = vsel %vm140_vm0, %v123_v29, 0.0  ;;  %v171_v47 = vadd.f32 %v170_v38, %v169_v33  ;;  %v185_v48 = vadd.f32 %v184_v39, %v183_v34  ;;  %594 = vmatpush1.bf16.msra.mxu1 %v1129_v30  ;;  %v1120_v28 = vld [vmem:[#allocation6 + $0x58] sm:$0xff]   ;;  %v1139_v33 = vld [vmem:[%s1603_s3 + $0x24] ss:$8 sps:$4 sm:$0xff]   ;;  %s1304_s5 = smov [#allocation11]  }
  0x3f   :  { %447 = vmatpush1.bf16.msra.mxu0 %v1114_v3  ;;  %v143_v45 = vadd.f32 %v142_v36, %v141_v31  ;;  %v157_v46 = vadd.f32 %v156_v37, %v155_v32  ;;  %v198_v49 = vrot.slane %v197_v40, 4  ;;  %v212_v50 = vrot.slane %v211_v41, 4  ;;  %595 = vmatprep.subr.bf16.mxu1 %v1130_v35  ;;  %s954_s17 = sshll.u32 %s1304_s5, 4  ;;  %s955_s17 = int_to_ptr.vmem [resolvable:$true] %s954_s17 }
  0x40   :  { %448 = vmatprep.subr.bf16.mxu0 %v1300_v1  ;;  %v226_v51 = vrot.slane %v225_v42, 4  ;;  %v240_v52 = vrot.slane %v239_v43, 4  ;;  %v172_v56 = vrot.slane %v171_v47, 2  ;;  %v186_v57 = vrot.slane %v185_v48, 2  ;;  %s1244_s18 = scalar_lea.vmem %s955_s17, 128  ;;  %p1249_p7 = scmp.lt.s32.totalorder %s955_s17, %s955_s17 }
  0x41   :  { %v144_v54 = vrot.slane %v143_v45, 2  ;;  %v158_v55 = vrot.slane %v157_v46, 2  ;;  %v199_v59 = vadd.f32 %v198_v49, %v197_v40  ;;  %v213_v60 = vadd.f32 %v212_v50, %v211_v41  ;;  %p1245_p6 = scmp.ne.s32.totalorder %s955_s17, %s1244_s18  ;;  %p1250_p8 = scmp.lt.s32.totalorder %s1244_s18, %s1244_s18 }
  0x42   :  { %v227_v61 = vadd.f32 %v226_v51, %v225_v42  ;;  %v241_v62 = vadd.f32 %v240_v52, %v239_v43  ;;  %v173_v3 = vadd.f32 %v172_v56, %v171_v47  ;;  %596 = vmatpush1.bf16.msra.mxu1 %v1132_v53  ;;  %vm352_vm7 = vcmask 1046534   ;;  %v1121_v47 = vld [vmem:[#allocation6 + $0x50] sm:$0xff]  }
  0x43   :  { %449 = vmatpush1.bf16.msra.mxu0 %v1115_v4  ;;  %v145_v0 = vadd.f32 %v144_v54, %v143_v45  ;;  %v159_v2 = vadd.f32 %v158_v55, %v157_v46  ;;  %v187_v4 = vadd.f32 %v186_v57, %v185_v48  ;;  %v214_v6 = vrot.slane %v213_v60, 2  ;;  %597 = vmatprep.subr.bf16.mxu1 %v1133_v58  ;;  %v1141_v46 = vld [vmem:[%s1603_s3 + $0x20] ss:$8 sps:$4 sm:$0xff]   ;;  %v1142_v52 = vld [vmem:[%s1603_s3 + $0x14] ss:$8 sps:$4 sm:$0xff]   ;;  %p1251_p9 = por %p1250_p8, %p1249_p7 }
  0x44   :  { %450 = vmatprep.subr.bf16.mxu0 %v1300_v1  ;;  %v228_v7 = vrot.slane %v227_v61, 2  ;;  %v242_v8 = vrot.slane %v241_v62, 2  ;;  %v174_v20 = vrot.slane %v173_v3, 1  ;;  %vm354_vm8 = vcmask 1047559  }
  0x45   :  { %v146_v18 = vrot.slane %v145_v0, 1  ;;  %v160_v19 = vrot.slane %v159_v2, 1  ;;  %v188_v21 = vrot.slane %v187_v4, 1  ;;  %v215_v24 = vadd.f32 %v214_v6, %v213_v60  ;;  %p1252_p10 = pnand %p1251_p9, %p1245_p6 }
  0x46   :  { %v243_v26 = vadd.f32 %v242_v8, %v241_v62  ;;  %v175_v31 = vadd.f32 %v174_v20, %v173_v3  ;;  %598 = vmatpush1.bf16.msra.mxu1 %v1135_v13  ;;  %vm438_vm9 = vcmask 523264   ;;  %v162_v6 = vsel %vm132_vm2, %v1387_v11, 0.0 }
  0x47   :  { %451 = vmatpush1.bf16.msra.mxu0 %v1116_v5  ;;  %v200_v5 = vrot.slane %v199_v59, 2  ;;  %v147_v29 = vadd.f32 %v146_v18, %v145_v0  ;;  %v161_v30 = vadd.f32 %v160_v19, %v159_v2  ;;  %v189_v32 = vadd.f32 %v188_v21, %v187_v4  ;;  %599 = vmatprep.subr.bf16.mxu1 %v1136_v22  ;;  %v1144_v2 = vld [vmem:[%s1603_s3 + $0x10] ss:$8 sps:$4 sm:$0xff]   ;;  %v1122_v19 = vld [vmem:[#allocation6 + $0x48] sm:$0xff]  }
  0x48   :  { %452 = vmatprep.subr.bf16.mxu0 %v1300_v1  ;;  %v216_v35 = vrot.slane %v215_v24, 1  ;;  %v244_v37 = vrot.slane %v243_v26, 1  ;;  %v252_v40 = vmul.f32 0.25, %v175_v31  ;;  %v133_v4 = vsel %vm132_vm2, %v1383_v9, 0.0 }
  0x49   :  { %v201_v23 = vadd.f32 %v200_v5, %v199_v59  ;;  %v248_v38 = vmul.f32 0.25, %v147_v29  ;;  %v250_v39 = vmul.f32 0.25, %v161_v30  ;;  %v254_v41 = vmul.f32 0.25, %v189_v32 }
  0x4a   :  { %v217_v43 = vadd.f32 %v216_v35, %v215_v24  ;;  %v245_v45 = vadd.f32 %v244_v37, %v243_v26  ;;  %v268_v50 = vpack.c.bf16 %v252_v40, %v252_v40  ;;  %600 = vmatpush1.bf16.msra.mxu1 %v1138_v27  ;;  %v148_v5 = vsel %vm132_vm2, %v1385_v10, 0.0 }
  0x4b   :  { %453 = vmatpush1.bf16.msra.mxu0 %v1117_v25  ;;  %v229_v25 = vadd.f32 %v228_v7, %v227_v61  ;;  %v202_v34 = vrot.slane %v201_v23, 1  ;;  %v264_v48 = vpack.c.bf16 %v248_v38, %v248_v38  ;;  %v266_v49 = vpack.c.bf16 %v250_v39, %v250_v39  ;;  %601 = vmatprep.subr.bf16.mxu1 %v1139_v33  ;;  %v1123_v33 = vld [vmem:[#allocation6 + $0x40] sm:$0xff]  }
  0x4c   :  { %454 = vmatprep.subr.bf16.mxu0 %v1300_v1  ;;  %v270_v51 = vpack.c.bf16 %v254_v41, %v254_v41  ;;  %v258_v54 = vmul.f32 0.25, %v217_v43  ;;  %v262_v56 = vmul.f32 0.25, %v245_v45  ;;  %v331_v59 = vunpack.c.l.b16 %v268_v50 }
  0x4d   :  { %v230_v36 = vrot.slane %v229_v25, 1  ;;  %v203_v42 = vadd.f32 %v202_v34, %v201_v23  ;;  %v327_v57 = vunpack.c.l.b16 %v264_v48  ;;  %v329_v58 = vunpack.c.l.b16 %v266_v49 }
  0x4e   :  { %v333_v60 = vunpack.c.l.b16 %v270_v51  ;;  %v274_v62 = vpack.c.bf16 %v258_v54, %v258_v54  ;;  %v278_v0 = vpack.c.bf16 %v262_v56, %v262_v56  ;;  %602 = vmatpush1.bf16.msra.mxu1 %v1141_v46  ;;  %v134_v21 = vrot.slane %v133_v4, 4 }
  0x4f   :  { %455 = vmatpush1.bf16.msra.mxu0 %v1118_v44  ;;  %v231_v44 = vadd.f32 %v230_v36, %v229_v25  ;;  %v256_v53 = vmul.f32 0.25, %v203_v42  ;;  %v356_v3 = vsel %vm342_vm1, %v329_v58, %v327_v57  ;;  %v149_v22 = vrot.slane %v148_v5, 4  ;;  %603 = vmatprep.subr.bf16.mxu1 %v1142_v52 }
  0x50   :  { %456 = vmatprep.subr.bf16.mxu0 %v1300_v1  ;;  %v337_v8 = vunpack.c.l.b16 %v274_v62  ;;  %v341_v18 = vunpack.c.l.b16 %v278_v0  ;;  %v357_v20 = vsel %vm344_vm3, %v331_v59, %v356_v3  ;;  %v163_v23 = vrot.slane %v162_v6, 4 }
  0x51   :  { %v260_v55 = vmul.f32 0.25, %v231_v44  ;;  %v272_v61 = vpack.c.bf16 %v256_v53, %v256_v53  ;;  %v358_v9 = vsel %vm346_vm4, %v333_v60, %v357_v20  ;;  %v176_v10 = vsel %vm132_vm2, %v1389_v12, 0.0 }
  0x52   :  { %v190_v11 = vsel %vm132_vm2, %v1391_v14, 0.0  ;;  %v204_v24 = vsel %vm132_vm2, %v1393_v15, 0.0  ;;  %v135_v26 = vadd.f32 %v134_v21, %v133_v4  ;;  %v150_v27 = vadd.f32 %v149_v22, %v148_v5  ;;  %604 = vmatpush1.bf16.msra.mxu1 %v1144_v2 }
  0x53   :  { %457 = vmatpush1.bf16.msra.mxu0 %v1119_v63  ;;  %v276_v63 = vpack.c.bf16 %v260_v55, %v260_v55  ;;  %v335_v7 = vunpack.c.l.b16 %v272_v61  ;;  %v177_v30 = vrot.slane %v176_v10, 4  ;;  %v191_v31 = vrot.slane %v190_v11, 4 }
  0x54   :  { %466 = vmatprep.subr.bf16.mxu0 %v1300_v1  ;;  %v205_v32 = vrot.slane %v204_v24, 4  ;;  %v136_v34 = vrot.slane %v135_v26, 2  ;;  %v151_v14 = vrot.slane %v150_v27, 2  ;;  %v218_v46 = vsel %vm132_vm2, %v1395_v16, 0.0 }
  0x55   :  { %v339_v13 = vunpack.c.l.b16 %v276_v63  ;;  %v359_v25 = vsel %vm348_vm5, %v335_v7, %v358_v9  ;;  %v178_v36 = vadd.f32 %v177_v30, %v176_v10  ;;  %v192_v37 = vadd.f32 %v191_v31, %v190_v11 }
  0x56   :  { %v360_v29 = vsel %vm350_vm6, %v337_v8, %v359_v25  ;;  %v206_v38 = vadd.f32 %v205_v32, %v204_v24  ;;  %v137_v40 = vadd.f32 %v136_v34, %v135_v26  ;;  %v152_v41 = vadd.f32 %v151_v14, %v150_v27 }
  0x57   :  { %467 = vmatpush2.bf16.msra.mxu0 %v1120_v28  ;;  %v164_v28 = vadd.f32 %v163_v23, %v162_v6  ;;  %v361_v12 = vsel %vm352_vm7, %v339_v13, %v360_v29  ;;  %v179_v43 = vrot.slane %v178_v36, 2  ;;  %v193_v44 = vrot.slane %v192_v37, 2 }
  0x58   :  { %468 = vmatprep.subr.bf16.mxu0 %v1300_v1  ;;  %v362_v15 = vsel %vm354_vm8, %v341_v18, %v361_v12  ;;  %v207_v45 = vrot.slane %v206_v38, 2  ;;  %v219_v49 = vrot.slane %v218_v46, 4  ;;  %v232_v53 = vsel %vm132_vm2, %v1397_v17, 0.0 }
  0x59   :  { %v165_v35 = vrot.slane %v164_v28, 2  ;;  %v364_v39 = vpack.c.b16 %v362_v15, %v362_v15  ;;  %v180_v50 = vadd.f32 %v179_v43, %v178_v36  ;;  %v194_v51 = vadd.f32 %v193_v44, %v192_v37  ;;  %v1145_v43 = vld [vmem:[%s1603_s3 + $0x4] ss:$8 sps:$4 sm:$0xff]   ;;  %v1147_v44 = vld [vmem:[%s1603_s3] ss:$8 sps:$4 sm:$0xff]  }
  0x5a   :  { %v208_v52 = vadd.f32 %v207_v45, %v206_v38  ;;  %v220_v57 = vadd.f32 %v219_v49, %v218_v46  ;;  %v233_v60 = vrot.slane %v232_v53, 4  ;;  %605 = vmatprep.subr.bf16.mxu1 %v1145_v43  ;;  %v1148_v45 = vld [vmem:[#allocation8 + $0x38] sm:$0xff]   ;;  %v1157_v49 = vld [vmem:[#allocation8 + $0x20] sm:$0xff]   ;;  %vm1302_vm10 = vmmov 0  }
  0x5b   :  { %469 = vmatpush2.bf16.msra.mxu0 %v1121_v47  ;;  %v166_v42 = vadd.f32 %v165_v35, %v164_v28  ;;  %986 = vmatprep.mubr.msk.bf16.mxu0 %vm438_vm9, %v364_v39  ;;  %v138_v47 = vrot.slane %v137_v40, 1  ;;  %v181_v58 = vrot.slane %v180_v50, 1  ;;  %v195_v59 = vrot.slane %v194_v51, 1  ;;  %v1149_v46 = vld [vmem:[%s1607_s7 + $0x78] sm:$0xff]  }
  0x5c   :  { %470 = vmatprep.subr.bf16.mxu0 %v1300_v1  ;;  %v209_v16 = vrot.slane %v208_v52, 1  ;;  %v221_v61 = vrot.slane %v220_v57, 2  ;;  %v234_v5 = vadd.f32 %v233_v60, %v232_v53  ;;  %606 = vmatpush1.bf16.msra.mxu1 %v1147_v44  ;;  %v973_v53 = vld [vmem:[%s1602_s2] ss:$0 sm:$0xff] }
  0x5d   :  { %v167_v48 = vrot.slane %v166_v42, 1  ;;  %v139_v54 = vadd.f32 %v138_v47, %v137_v40  ;;  %v182_v2 = vadd.f32 %v181_v58, %v180_v50  ;;  %v196_v3 = vadd.f32 %v195_v59, %v194_v51  ;;  %1049 = vmatprep.subr.bf16.mxu1 %v1149_v46  ;;  %v1160_v50 = vld [vmem:[#allocation8 + $0x18] sm:$0xff]   ;;  %v1163_v51 = vld [vmem:[#allocation8 + $0x10] sm:$0xff]  }
  0x5e   :  { %v210_v4 = vadd.f32 %v209_v16, %v208_v52  ;;  %v222_v6 = vadd.f32 %v221_v61, %v220_v57  ;;  %v235_v13 = vrot.slane %v234_v5, 2  ;;  %v1301_v47 = vmov 0.0   ;;  %v1166_v52 = vld [vmem:[#allocation8 + $0x8] sm:$0xff]   ;;  %v1150_v57 = vld [vmem:[%s1607_s7 + $0x38] sm:$0xff]   ;;  %v1152_v59 = vld [vmem:[%s1607_s7 + $0x70] sm:$0xff]  }
  0x5f   :  { %471 = vmatpush2.bf16.msra.mxu0 %v1122_v19  ;;  %v168_v56 = vadd.f32 %v167_v48, %v166_v42  ;;  %v247_v62 = vmul.f32 0.25, %v139_v54  ;;  %v253_v18 = vmul.f32 0.25, %v182_v2  ;;  %v255_v19 = vmul.f32 0.25, %v196_v3  ;;  %v1154_v48 = vld [vmem:[#allocation8 + $0x28] sm:$0xff]   ;;  %v1153_v61 = vld [vmem:[%s1607_s7 + $0x30] sm:$0xff]   ;;  %v1159_v2 = vld [vmem:[%s1607_s7 + $0x20] sm:$0xff]  }
  0x60   :  { %472 = vmatprep.subr.bf16.mxu0 %v1300_v1  ;;  %v153_v1 = vrot.slane %v152_v41, 1  ;;  %v257_v20 = vmul.f32 0.25, %v210_v4  ;;  %v223_v21 = vrot.slane %v222_v6, 1  ;;  %v236_v10 = vadd.f32 %v235_v13, %v234_v5  ;;  %v1161_v3 = vld [vmem:[%s1607_s7 + $0x58] sm:$0xff]   ;;  %v1164_v5 = vld [vmem:[%s1607_s7 + $0x50] sm:$0xff]   ;;  %v1170_v13 = vld [vmem:[%s1607_s7 + $0x40] sm:$0xff]  }
  0x61   :  { %v251_v0 = vmul.f32 0.25, %v168_v56  ;;  %v263_v7 = vpack.c.bf16 %v247_v62, %v247_v62  ;;  %v269_v11 = vpack.c.bf16 %v253_v18, %v253_v18  ;;  %v271_v24 = vpack.c.bf16 %v255_v19, %v255_v19  ;;  %v1155_v62 = vld [vmem:[%s1607_s7 + $0x68] sm:$0xff]   ;;  %v1162_v4 = vld [vmem:[%s1607_s7 + $0x18] sm:$0xff]   ;;  %v1171_v18 = vld [vmem:[%s1607_s7] sm:$0xff]  }
  0x62   :  { %v154_v55 = vadd.f32 %v153_v1, %v152_v41  ;;  %v273_v25 = vpack.c.bf16 %v257_v20, %v257_v20  ;;  %v224_v26 = vadd.f32 %v223_v21, %v222_v6  ;;  %v237_v28 = vrot.slane %v236_v10, 1  ;;  %v1151_v1 = vld [vmem:[#allocation8 + $0x30] sm:$0xff]  }
  0x63   :  { %473 = vmatpush2.bf16.msra.mxu0 %v1123_v33  ;;  %v267_v17 = vpack.c.bf16 %v251_v0, %v251_v0  ;;  %v326_v22 = vunpack.c.l.b16 %v263_v7  ;;  %v332_v29 = vunpack.c.l.b16 %v269_v11  ;;  %v334_v30 = vunpack.c.l.b16 %v271_v24  ;;  %v1158_v0 = vld [vmem:[%s1607_s7 + $0x60] sm:$0xff]   ;;  %v1165_v6 = vld [vmem:[%s1607_s7 + $0x10] sm:$0xff]   ;;  %v1167_v7 = vld [vmem:[%s1607_s7 + $0x48] sm:$0xff]  }
  0x64   :  { %v249_v63 = vmul.f32 0.25, %v154_v55  ;;  %v336_v31 = vunpack.c.l.b16 %v273_v25  ;;  %v259_v32 = vmul.f32 0.25, %v224_v26  ;;  %v238_v12 = vadd.f32 %v237_v28, %v236_v10  ;;  %1080 = vmatprep.subr.bf16.mxu0 %v1301_v47 }
  0x65   :  { %v330_v9 = vunpack.c.l.b16 %v267_v17  ;;  %v1169_v17 = vld [vmem:[#allocation8] sm:$0xff]   ;;  %v501_v19 = vlaneseq }
  0x66   :  { %v265_v8 = vpack.c.bf16 %v249_v63, %v249_v63  ;;  %v275_v14 = vpack.c.bf16 %v259_v32, %v259_v32  ;;  %v261_v15 = vmul.f32 0.25, %v238_v12  ;;  %v1156_v63 = vld [vmem:[%s1607_s7 + $0x28] sm:$0xff]  }
  0x67   :  { %v502_v20 = vshrl.u32 %v501_v19, 7 }
  0x68   :  { %v328_v23 = vunpack.c.l.b16 %v265_v8  ;;  %v338_v37 = vunpack.c.l.b16 %v275_v14  ;;  %v277_v38 = vpack.c.bf16 %v261_v15, %v261_v15  ;;  %v1168_v8 = vld [vmem:[%s1607_s7 + $0x8] sm:$0xff]   ;;  %s1573_s7 = sld [smem:[#allocation9]] }
  0x69   :  { %v503_v21 = vsub.s32 0, %v502_v20 }
  0x6a   :  { %v343_v27 = vsel %vm342_vm1, %v328_v23, %v326_v22  ;;  %v340_v40 = vunpack.c.l.b16 %v277_v38  ;;  %v499_v22 = vld [vmem:[%s1604_s4] sm:$0x3]  ;;  %v507_v23 = vsub.s32 1, %v502_v20 }
  0x6b   :  { %v345_v33 = vsel %vm344_vm3, %v330_v9, %v343_v27  ;;  %v504_v9 = vrot.slane %v499_v22, %v503_v21 }
  0x6c   :  { %v347_v34 = vsel %vm346_vm4, %v332_v29, %v345_v33  ;;  %v508_v10 = vrot.slane %v499_v22, %v507_v23 }
  0x6d   :  { %v349_v35 = vsel %vm348_vm5, %v334_v30, %v347_v34 }
  0x6e   :  { %v351_v36 = vsel %vm350_vm6, %v336_v31, %v349_v35  ;;  %v1021_v31 = vld [vmem:[%s1606_s6] ss:$0 sm:$0xff] }
  0x6f   :  { %v353_v39 = vsel %vm352_vm7, %v338_v37, %v351_v36 }
  0x70   :  { %v355_v41 = vsel %vm354_vm8, %v340_v40, %v353_v39 }
  0x71   :  { %v363_v42 = vpack.c.b16 %v355_v41, %v355_v41 }
  0x73   :  { %475 = vmatmul.mubr.bf16.vlgmr.msra.gmra.mxu0 %v363_v42 }
  0x74   :  { %1081 = vmatpush3.bf16.msra.mxu0 %v1148_v45  ;;  %1096 = vmatprep.mubr.msk.bf16.mxu0 %vm1302_vm10, %v1301_v47 }
  0x75   :  { %1082 = vmatprep.subr.bf16.mxu0 %v1301_v47 }
  0x78   :  { %1083 = vmatpush3.bf16.msra.mxu0 %v1151_v1 }
  0x79   :  { %1084 = vmatprep.subr.bf16.mxu0 %v1301_v47 }
  0x7c   :  { %1085 = vmatpush3.bf16.msra.mxu0 %v1154_v48 }
  0x7d   :  { %1086 = vmatprep.subr.bf16.mxu0 %v1301_v47 }
  0x80   :  { %1087 = vmatpush3.bf16.msra.mxu0 %v1157_v49 }
  0x81   :  { %1088 = vmatprep.subr.bf16.mxu0 %v1301_v47 }
  0x84   :  { %1089 = vmatpush3.bf16.msra.mxu0 %v1160_v50 }
  0x85   :  { %1090 = vmatprep.subr.bf16.mxu0 %v1301_v47 }
  0x88   :  { %1091 = vmatpush3.bf16.msra.mxu0 %v1163_v51 }
  0x89   :  { %1092 = vmatprep.subr.bf16.mxu0 %v1301_v47 }
  0x8c   :  { %1093 = vmatpush3.bf16.msra.mxu0 %v1166_v52 }
  0x8d   :  { %1094 = vmatprep.subr.bf16.mxu0 %v1301_v47 }
  0x90   :  { %1095 = vmatpush3.bf16.msra.mxu0 %v1169_v17 }
 0x133   :  { %v476_v54 = vpop.f32.mrf.mxu0 }
 0x134   :  { %v477_v55 = vadd.f32 %v973_v53, %v476_v54 }
 0x135   :  { %v478_v56 = vpop.f32.mrf.mxu0 }
 0x136   :  { %v482_v58 = vpack.c.bf16 %v477_v55, %v477_v55 }
 0x137   :  { %v479_v16 = vpop.f32.mrf.mxu0 }
 0x138   :  { %624 = vmatmul.mubr.bf16.vlgmr.msra.gmra.mxu1 %v482_v58 }
 0x139   :  { %v480_v60 = vpop.f32.mrf.mxu0  ;;  %1050 = vmatpush3.bf16.msra.mxu1 %v1150_v57 }
 0x13a   :  { %1051 = vmatprep.subr.bf16.mxu1 %v1152_v59 }
 0x13d   :  { %1052 = vmatpush3.bf16.msra.mxu1 %v1153_v61 }
 0x13e   :  { %1053 = vmatprep.subr.bf16.mxu1 %v1155_v62 }
 0x141   :  { %1054 = vmatpush3.bf16.msra.mxu1 %v1156_v63 }
 0x142   :  { %1055 = vmatprep.subr.bf16.mxu1 %v1158_v0 }
 0x145   :  { %1056 = vmatpush3.bf16.msra.mxu1 %v1159_v2 }
 0x146   :  { %1057 = vmatprep.subr.bf16.mxu1 %v1161_v3 }
 0x149   :  { %1058 = vmatpush3.bf16.msra.mxu1 %v1162_v4 }
 0x14a   :  { %1059 = vmatprep.subr.bf16.mxu1 %v1164_v5 }
 0x14d   :  { %1060 = vmatpush3.bf16.msra.mxu1 %v1165_v6 }
 0x14e   :  { %1061 = vmatprep.subr.bf16.mxu1 %v1167_v7 }
 0x151   :  { %1062 = vmatpush3.bf16.msra.mxu1 %v1168_v8 }
 0x152   :  { %1063 = vmatprep.subr.bf16.mxu1 %v1170_v13 }
 0x155   :  { %1064 = vmatpush3.bf16.msra.mxu1 %v1171_v18 }
 0x1f8   :  { %v625_v11 = vpop.f32.mrf.mxu1 }
 0x1f9   :  { %v626_v24 = vadd.f32 %v625_v11, %v504_v9 }
 0x1fa   :  { %v627_v25 = vpop.f32.mrf.mxu1 }
 0x1fb   :  { %v632_v26 = vpack.c.bf16 %v626_v24, %v626_v24  ;;  %v628_v27 = vadd.f32 %v627_v25, %v508_v10 }
 0x1fc   :  { %v629_v28 = vpop.f32.mrf.mxu1 }
 0x1fd   :  { %v633_v29 = vpack.c.bf16 %v628_v27, %v628_v27  ;;  %917 = vst [vmem:[#allocation11] sm:$0xff] %v628_v27  ;;  %1097 = vmatmul.mubr.bf16.vlgmr.msra.gmra.mxu0 %v632_v26 }
 0x1fe   :  { %v630_v30 = vpop.f32.mrf.mxu1 }
 0x1ff   :  { %794 = vmatprep.mubr.bf16.mxu1 %v633_v29 }
 0x200   :  { %795 = vmatmul.mubr.bf16.vlgmr.msra.gmra.mxu1 %v632_v26 }
 0x2bd   :  { %v910_v32 = vpop.f32.mrf.mxu0 }
 0x2be   :  { %v911_v33 = vadd.f32 %v1021_v31, %v910_v32 }
 0x2bf   :  { %v1098_v12 = vpop.f32.mrf.mxu0 }
 0x2c0   :  { %916 = vst [vmem:[#allocation10] sm:$0xff] %v911_v33  ;;  %v1065_v34 = vpop.f32.mrf.mxu1 }
 0x2c1   :  { %1255 = shalt.err (!%p1252_p10)
}
 0x2c2   :  { %957 = dma.vmem_to_hbm [thread:$0]  %s955_s17, 128, %s1610_s10, [#allocation12]   ;;  %v913_v14 = vpop.f32.mrf.mxu0 }
 0x2c3   :  { %s1264_s20 = scalar_lea.vmem %s945_s8, 128  ;;  %p1269_p12 = scmp.lt.s32.totalorder %s945_s8, %s945_s8 }
 0x2c4   :  { %p1265_p11 = scmp.ne.s32.totalorder %s945_s8, %s1264_s20  ;;  %p1270_p13 = scmp.lt.s32.totalorder %s1264_s20, %s1264_s20 }
 0x2c6   :  { %p1271_p0 = por %p1270_p13, %p1269_p12 }
 0x2c8   :  { %p1272_p1 = pnand %p1271_p0, %p1265_p11 }
 0x2ca   :  { %1275 = shalt.err (!%p1272_p1)
}
 0x2cb   :  { %947 = dma.vmem_to_hbm [thread:$0]  %s945_s8, 128, %s1609_s9, [#allocation4]   ;;  %v1066_v35 = vpop.f32.mrf.mxu1  ;;  %v918_v15 = vstv %s1573_s7  ;;  %v922_v36 = vstv %s1575_s1  ;;  %v1099_v38 = vpop.f32.mrf.mxu0  ;;  %v924_v40 = vstv %s1580_s16  ;;  %vm920_vm11 = vcmask 7168  }
 0x2cc   :  { %v1067_v37 = vadd.f32 %v1066_v35, %v1065_v34  ;;  %s1305_s24 = smov 1   ;;  %vm930_vm12 = vcmask 15368   ;;  %vm936_vm13 = vcmask 23568  }
 0x2cd   :  { %v1068_v39 = vpop.f32.mrf.mxu1 }
 0x2ce   :  { %v919_v41 = vadd.f32 %v1067_v37, %v918_v15  ;;  %v923_v42 = vmul.f32 %v1067_v37, %v922_v36 }
 0x2cf   :  { %v1069_v43 = vpop.f32.mrf.mxu1 }
 0x2d0   :  { %v925_v44 = vadd.f32 %v924_v40, %v923_v42  ;;  %921 = vst.msk [vmem:[%s1611_s11] sm:$0xff] %vm920_vm11, %v919_v41 }
 0x2d2   :  { %927 = vrot.lane.b32.xlu0 %v925_v44, %s1305_s24 }
 0x2d6   :  { %933 = vrot.lane.b32.xlu0 %v1067_v37, %s1305_s24 }
 0x344   :  { %v928_v45 = vpop.permute.xlu0 %927 }
 0x345   :  { %931 = vst.msk [vmem:[%s1611_s11] sm:$0xff] %vm930_vm12, %v928_v45 }
 0x348   :  { %v934_v46 = vpop.permute.xlu0 %933 }
 0x349   :  { %937 = vst.msk [vmem:[%s1611_s11] sm:$0xff] %vm936_vm13, %v934_v46 }
 0x34a   :  { %1290 = dma.done.wait [#allocation4], 128  }
 0x34b   :  { %1291 = vsyncadd [#allocation4], 4294967168 }
 0x34c   :  { %1292 = dma.done.wait [#allocation12], 128  }
 0x34d   :  { %1293 = vsyncadd [#allocation12], 4294967168 }
 0x34e   :  { %968 = vsyncpa [#allocation3], 1 }
 0x34f   :  { %969 = vsyncpa [#allocation7], 1 }
 0x350   :  { %970 = vsyncpa [#allocation4], 1 }
 0x351   :  { %971 = vsyncpa [#allocation12], 1 }
 0x352   :  { %972 = vsyncpa [#allocation5], 1 }

</bundles_post_ra>
